<compile_context>
chip_gen: v7x
topology: tpu7x:2x2x1
jax: 0.10.0
libtpu: 0.0.40
codegen_flags: <defaults>
</compile_context>

<pallas_src>
import jax
import jax.numpy as jnp
from jax.experimental import pallas as pl
from jax.experimental.pallas import tpu as pltpu


def _round_up(v, m):
    return (v + m - 1) // m * m


def _linear_relu_kernel(x_ref, w_ref, b_ref, o_ref):
    # x_ref: [tm, K] bf16, w_ref: [K, Np] bf16, b_ref: [1, Np] f32,
    # o_ref: [tm, Np] in the caller's output dtype.
    acc = jnp.dot(x_ref[...], w_ref[...], preferred_element_type=jnp.float32)
    acc = acc + b_ref[0, :]                 # f32 bias, row-broadcast
    o_ref[...] = jnp.maximum(acc, 0.0).astype(o_ref.dtype)


def textual_feature_adaptor(x, weight, bias, *, tm=None,
                            compute_dtype=jnp.bfloat16):
    """relu(x @ weight + bias).

    x:      [..., K]  (any leading dims)
    weight: [K, N]    (already transposed vs. PyTorch's [N, K] storage)
    bias:   [N]
    """
    *lead, K = x.shape
    Kw, N = weight.shape
    assert Kw == K, "weight must be [K, N]"
    out_dtype = x.dtype

    M = 1
    for d in lead:
        M *= d

    # ---- tile / padding selection ---------------------------------------
    SUB = 16        # bf16 sublane quantum (also satisfies f32's 8)
    LANE = 128      # lane width -> lane-dense (unmasked) output stores
    if tm is None:
        tm = min(512, _round_up(M, SUB))
    tm = max(SUB, _round_up(tm, SUB))
    M_pad = _round_up(M, tm)
    N_pad = _round_up(N, LANE)

    # ---- prepare operands (bf16 streams, f32 bias) -----------------------
    x2 = x.reshape(M, K).astype(compute_dtype)
    if M_pad != M:
        x2 = jnp.pad(x2, ((0, M_pad - M), (0, 0)))
    w = weight.astype(compute_dtype)
    b = bias.astype(jnp.float32)
    if N_pad != N:
        w = jnp.pad(w, ((0, 0), (0, N_pad - N)))
        b = jnp.pad(b, (0, N_pad - N))
    b2 = b.reshape(1, N_pad)

    # ---- explicit VMEM budget: 2x double-buffered x/out tiles + resident W/b
    bpe_in = jnp.dtype(compute_dtype).itemsize
    bpe_out = jnp.dtype(out_dtype).itemsize
    est = (2 * (tm * K * bpe_in + tm * N_pad * bpe_out)
           + 2 * (K * N_pad * bpe_in + N_pad * 4))
    vmem_limit = int(min(max(2 * est, 16 * 1024 * 1024), 64 * 1024 * 1024))

    grid = (M_pad // tm,)
    out2 = pl.pallas_call(
        _linear_relu_kernel,
        out_shape=jax.ShapeDtypeStruct((M_pad, N_pad), out_dtype),
        grid_spec=pltpu.PrefetchScalarGridSpec(
            num_scalar_prefetch=0,
            grid=grid,
            in_specs=[
                pl.BlockSpec((tm, K), lambda i: (i, 0)),       # streamed x tile
                pl.BlockSpec((K, N_pad), lambda i: (0, 0)),    # resident weight
                pl.BlockSpec((1, N_pad), lambda i: (0, 0)),    # resident bias
            ],
            out_specs=pl.BlockSpec((tm, N_pad), lambda i: (i, 0)),
        ),
        compiler_params=pltpu.CompilerParams(
            dimension_semantics=("parallel",),
            vmem_limit_bytes=vmem_limit),
    )(x2, w, b2)

    # TODO(synk): add a K-reduction grid axis with an f32 VMEM accumulator
    # (pl.when init/finalize) if K*N_pad weight stops fitting the per-gen
    # VMEM budget (first to matter on v7x's 64 MiB).
    return out2[:M, :N].reshape(*lead, N)


def init_linear_params(key, input_size, output_size, dtype=jnp.float32):
    # Mirrors nn.Linear default init: U(-1/sqrt(fan_in), 1/sqrt(fan_in)).
    kw, kb = jax.random.split(key)
    bound = 1.0 / (input_size ** 0.5)
    # Stored as [K, N] so the kernel can do x @ W directly.
    weight = jax.random.uniform(
        kw, (input_size, output_size), dtype=dtype, minval=-bound, maxval=bound)
    bias = jax.random.uniform(
        kb, (output_size,), dtype=dtype, minval=-bound, maxval=bound)
    return weight, bias


if __name__ == "__main__":
    key = jax.random.PRNGKey(0)
    k_x, k_p = jax.random.split(key)

    batch, seq, input_size, output_size = 2, 8, 32, 64
    x = jax.random.normal(k_x, (batch, seq, input_size), dtype=jnp.float32)
    weight, bias = init_linear_params(k_p, input_size, output_size)

    out = jax.block_until_ready(textual_feature_adaptor(x, weight, bias))

    # Reference with the same bf16 input/weight rounding, f32 accumulation.
    x_bf = x.astype(jnp.bfloat16).astype(jnp.float32)
    w_bf = weight.astype(jnp.bfloat16).astype(jnp.float32)
    ref = jnp.maximum(x_bf @ w_bf + bias, 0.0)

    assert out.shape == (batch, seq, output_size)
    assert jnp.allclose(out, ref, atol=1e-3, rtol=1e-3), \
        float(jnp.max(jnp.abs(out - ref)))

    # Sanity vs. the full-f32 PyTorch-equivalent math (looser: bf16 inputs).
    ref_f32 = jnp.maximum(x @ weight + bias, 0.0)
    assert jnp.allclose(out, ref_f32, atol=2e-2, rtol=2e-2)

    print("KERNEL_OK")
</pallas_src>

<mosaic_0001>
module attributes {stable_mosaic.version = 11 : i64} {
  func.func @_linear_relu_kernel(%arg0: i32, %arg1: memref<16x32xbf16, #tpu.memory_space<vmem>>, %arg2: memref<32x128xbf16, #tpu.memory_space<vmem>>, %arg3: memref<1x128xf32, #tpu.memory_space<vmem>>, %arg4: memref<16x128xf32, #tpu.memory_space<vmem>>) attributes {dimension_semantics = [#tpu.dimension_semantics<parallel>], iteration_bounds = array<i64: 1>, scalar_prefetch = 0 : i64, scratch_operands = 0 : i64, tpu.core_type = #tpu.core_type<tc>, window_params = [{transform_indices = @transform_0, window_bounds = array<i64: 16, 32>}, {pipeline_mode = #tpu.pipeline_mode<synchronous>, transform_indices = @transform_1, window_bounds = array<i64: 32, 128>}, {pipeline_mode = #tpu.pipeline_mode<synchronous>, transform_indices = @transform_2, window_bounds = array<i64: 1, 128>}, {transform_indices = @transform_3, window_bounds = array<i64: 16, 128>}]} {
    %c0 = arith.constant 0 : index
    %c0_0 = arith.constant 0 : index
    %0 = vector.load %arg1[%c0, %c0_0] : memref<16x32xbf16, #tpu.memory_space<vmem>>, vector<16x32xbf16>
    %c0_1 = arith.constant 0 : index
    %c0_2 = arith.constant 0 : index
    %1 = vector.load %arg2[%c0_1, %c0_2] : memref<32x128xbf16, #tpu.memory_space<vmem>>, vector<32x128xbf16>
    %cst = arith.constant dense<0.000000e+00> : vector<16x128xf32>
    %2 = tpu.matmul %0, %1, %cst {dimension_numbers = #tpu.dot_dimension_numbers<[1], [0], [0], [1], [0, 0, 1, 1], [], []>} : vector<16x32xbf16>, vector<32x128xbf16>, vector<16x128xf32> -> vector<16x128xf32>
    %c0_3 = arith.constant 0 : index
    %c0_4 = arith.constant 0 : index
    %3 = vector.load %arg3[%c0_3, %c0_4] : memref<1x128xf32, #tpu.memory_space<vmem>>, vector<1x128xf32>
    %4 = vector.shape_cast %3 : vector<1x128xf32> to vector<128xf32>
    %5 = vector.shape_cast %4 : vector<128xf32> to vector<1x128xf32>
    %6 = vector.broadcast %5 : vector<1x128xf32> to vector<16x128xf32>
    %7 = arith.addf %2, %6 : vector<16x128xf32>
    %cst_5 = arith.constant 0.000000e+00 : f32
    %8 = vector.broadcast %cst_5 : f32 to vector<16x128xf32>
    %9 = arith.maximumf %7, %8 : vector<16x128xf32>
    %c0_6 = arith.constant 0 : index
    %c0_7 = arith.constant 0 : index
    %10 = vector.load %arg4[%c0_6, %c0_7] : memref<16x128xf32, #tpu.memory_space<vmem>>, vector<16x128xf32>
    tpu.vector_store %arg4[%c0_6, %c0_7], %9 {strides = array<i32>} : memref<16x128xf32, #tpu.memory_space<vmem>>, vector<16x128xf32>,
    return
  }
  func.func @transform_0(%arg0: i32) -> (i32, i32) {
    %c0_i32 = arith.constant 0 : i32
    %c0_i32_0 = arith.constant 0 : i32
    return %arg0, %c0_i32 : i32, i32
  }
  func.func @transform_1(%arg0: i32) -> (i32, i32) {
    %c0_i32 = arith.constant 0 : i32
    %c0_i32_0 = arith.constant 0 : i32
    %c0_i32_1 = arith.constant 0 : i32
    return %c0_i32, %c0_i32_0 : i32, i32
  }
  func.func @transform_2(%arg0: i32) -> (i32, i32) {
    %c0_i32 = arith.constant 0 : i32
    %c0_i32_0 = arith.constant 0 : i32
    %c0_i32_1 = arith.constant 0 : i32
    return %c0_i32, %c0_i32_0 : i32, i32
  }
  func.func @transform_3(%arg0: i32) -> (i32, i32) {
    %c0_i32 = arith.constant 0 : i32
    %c0_i32_0 = arith.constant 0 : i32
    return %arg0, %c0_i32 : i32, i32
  }
}

</mosaic_0001>

<bundles_post_ra>
// kernel: tpu_custom_call.1
= control target key start
LH: loop header
LB: loop body
LE: loop exit
PB: predicated region body
PF: predicated region fallthrough
CT: control target
= control target key end

     0   :  { %8 = vsyncpa [#allocation3], 0  ;;  %s309_s0 = inlined_call_operand.hbm [shape: bf16[16,32], index: 0, kind: input, shape index: {}]   ;;  %s310_s1 = inlined_call_operand.hbm [shape: bf16[32,128], index: 1, kind: input, shape index: {}]   ;;  %s311_s2 = inlined_call_operand.vmem [shape: f32[1,128], index: 2, kind: input, shape index: {}]   ;;  %s312_s3 = inlined_call_operand.hbm [shape: f32[16,128], index: 3, kind: output, shape index: {}]  }
   0x1   :  { %9 = vsyncpa [#allocation6], 0 }
   0x2   :  { %10 = vsyncpa [#allocation4], 0  ;;  %s241_s12 = smov [#allocation2]   ;;  %s169_s16 = scalar_lea.hbm %s309_s0, 128 }
   0x3   :  { %s16_s13 = sshll.u32 %s241_s12, 4  ;;  %p170_p0 = scmp.ne.s32.totalorder %s309_s0, %s169_s16  ;;  %s17_s13 = int_to_ptr.vmem [resolvable:$true] %s16_s13 }
   0x4   :  { %p173_p1 = scmp.lt.u32.totalorder %s169_s16, %s309_s0 }
   0x6   :  { %p175_p2 = pnand %p173_p1, %p170_p0 }
   0x8   :  { %178 = shalt.err (!%p175_p2)
}
   0x9   :  { %s179_s21 = scalar_lea.vmem %s17_s13, 128  ;;  %p184_p4 = scmp.lt.s32.totalorder %s17_s13, %s17_s13 }
   0xa   :  { %p180_p3 = scmp.ne.s32.totalorder %s17_s13, %s179_s21  ;;  %p185_p5 = scmp.lt.s32.totalorder %s179_s21, %s179_s21 }
   0xc   :  { %p186_p6 = por %p185_p5, %p184_p4 }
   0xe   :  { %p187_p7 = pnand %p186_p6, %p180_p3 }
  0x10   :  { %190 = shalt.err (!%p187_p7)
}
  0x11   :  { %s242_s22 = smov 64   ;;  %s243_s23 = smov 4  }
  0x12   :  { %22 = dma.hbm_to_vmem [thread:$0]  %s309_s0, 128, %s17_s13, [#allocation3], %s242_s22, %s242_s22, %s243_s23  }
  0x13   :  { %s244_s26 = smov [#allocation5]   ;;  %s191_s30 = scalar_lea.hbm %s310_s1, 256 }
  0x14   :  { %s28_s27 = sshll.u32 %s244_s26, 4  ;;  %p192_p8 = scmp.ne.s32.totalorder %s310_s1, %s191_s30  ;;  %s29_s27 = int_to_ptr.vmem [resolvable:$true] %s28_s27 }
  0x15   :  { %p195_p9 = scmp.lt.u32.totalorder %s191_s30, %s310_s1 }
  0x17   :  { %p197_p10 = pnand %p195_p9, %p192_p8 }
  0x19   :  { %200 = shalt.err (!%p197_p10)
}
  0x1a   :  { %s201_s8 = scalar_lea.vmem %s29_s27, 256  ;;  %p206_p12 = scmp.lt.s32.totalorder %s29_s27, %s29_s27 }
  0x1b   :  { %p202_p11 = scmp.ne.s32.totalorder %s29_s27, %s201_s8  ;;  %p207_p13 = scmp.lt.s32.totalorder %s201_s8, %s201_s8 }
  0x1d   :  { %p208_p0 = por %p207_p13, %p206_p12 }
  0x1f   :  { %p209_p1 = pnand %p208_p0, %p202_p11 }
  0x21   :  { %212 = shalt.err (!%p209_p1)
}
  0x22   :  { %34 = dma.hbm_to_vmem [thread:$0]  %s310_s1, 256, %s29_s27, [#allocation6], %s242_s22, %s242_s22, %s243_s23  }
  0x23   :  { %235 = dma.done.wait [#allocation3], 128  }
  0x24   :  { %236 = vsyncadd [#allocation3], 4294967168 }
  0x25   :  { %237 = dma.done.wait [#allocation6], 256  }
  0x26   :  { %238 = vsyncadd [#allocation6], 4294967040  ;;  %v245_v0 = vmov 0.0   ;;  %vm246_vm0 = vmmov 0   ;;  %v166_v1 = vld [vmem:[#allocation5] sm:$0xff]   ;;  %v167_v2 = vld [vmem:[#allocation5 + $0x8] sm:$0xff]  }
  0x27   :  { %149 = vmatprep.subr.bf16.mxu0 %v245_v0  ;;  %153 = vmatprep.mubr.msk.bf16.mxu0 %vm246_vm0, %v245_v0  ;;  %v168_v3 = vld [vmem:[#allocation2] sm:$0xff]   ;;  %vm74_vm1 = vcmask 261120   ;;  %s247_s1 = smov [#allocation7]  }
  0x28   :  { %150 = vmatpush3.bf16.msra.mxu0 %v166_v1  ;;  %v141_v4 = vld [vmem:[%s311_s2] ss:$0 sm:$0xff]  ;;  %s128_s12 = sshll.u32 %s247_s1, 4  ;;  %s129_s12 = int_to_ptr.vmem [resolvable:$true] %s128_s12 }
  0x29   :  { %151 = vmatprep.subr.bf16.mxu0 %v245_v0  ;;  %s213_s13 = scalar_lea.vmem %s129_s12, 256  ;;  %p218_p3 = scmp.lt.s32.totalorder %s129_s12, %s129_s12 }
  0x2a   :  { %p214_p2 = scmp.ne.s32.totalorder %s129_s12, %s213_s13  ;;  %p219_p4 = scmp.lt.s32.totalorder %s213_s13, %s213_s13 }
  0x2c   :  { %152 = vmatpush3.bf16.msra.mxu0 %v167_v2  ;;  %p220_p5 = por %p219_p4, %p218_p3 }
  0x2e   :  { %p221_p6 = pnand %p220_p5, %p214_p2 }
  0x2f   :  { %154 = vmatmul.mubr.msk.bf16.vlgmr.msra.gmra.mrb[0].mxu0 %vm74_vm1, %v168_v3 }
 0x102   :  { %v112_v5 = vpop.f32.mrb[0].mxu0 }
 0x103   :  { %v113_v6 = vadd.f32 %v141_v4, %v112_v5  ;;  %v155_v7 = vpop.f32.mrb[1].mxu0 }
 0x104   :  { %v115_v8 = vpop.f32.mrb[2].mxu0 }
 0x105   :  { %v119_v9 = vmax.f32 %v113_v6, 0.0  ;;  %v116_v10 = vadd.f32 %v141_v4, %v115_v8  ;;  %v156_v11 = vpop.f32.mrb[3].mxu0 }
 0x107   :  { %121 = vst [vmem:[#allocation7] sm:$0xff] %v119_v9  ;;  %v120_v12 = vmax.f32 %v116_v10, 0.0 }
 0x109   :  { %122 = vst [vmem:[#allocation7 + $0x8] sm:$0xff] %v120_v12 }
 0x10a   :  { %224 = shalt.err (!%p221_p6)
}
 0x10b   :  { %s225_s15 = scalar_lea.hbm %s312_s3, 256 }
 0x10c   :  { %p226_p7 = scmp.ne.s32.totalorder %s312_s3, %s225_s15  ;;  %p229_p8 = scmp.lt.u32.totalorder %s225_s15, %s312_s3 }
 0x10e   :  { %p231_p9 = pnand %p229_p8, %p226_p7 }
 0x110   :  { %234 = shalt.err (!%p231_p9)
}
 0x111   :  { %s248_s20 = smov 128   ;;  %s249_s21 = smov 8  }
 0x112   :  { %134 = dma.vmem_to_hbm [thread:$0]  %s129_s12, 256, %s312_s3, [#allocation4], %s248_s20, %s248_s20, %s249_s21  }
 0x113   :  { %239 = dma.done.wait [#allocation4], 256  }
 0x114   :  { %240 = vsyncadd [#allocation4], 4294967040 }
 0x115   :  { %138 = vsyncpa [#allocation3], 1 }
 0x116   :  { %139 = vsyncpa [#allocation6], 1 }
 0x117   :  { %140 = vsyncpa [#allocation4], 1 }

</bundles_post_ra>
